<compile_context>
chip_gen: v7x
topology: tpu7x:2x2x1
jax: 0.10.0
libtpu: 0.0.40
codegen_flags: <defaults>
</compile_context>

<pallas_src>
import functools

import jax
import jax.numpy as jnp
from jax.experimental import pallas as pl
from jax.experimental.pallas import tpu as pltpu

TRAIN_YEAR = 5               # number of years / LSTM sequence length
SUPPORT = 5                  # number of relations per year
HIDDEN = 4                   # MSTGCN num_for_predict per branch
NODE_FEAT = 4                # fixed by feature.reshape(1, -1, 4, 1)
LSTM_IN = SUPPORT * HIDDEN   # 20
LSTM_HID = 32
GATE = 4 * LSTM_HID          # 128 packed gate lanes, order [i, f, o, g]
LANE = 128                   # TPU vreg lane width
RPAD = 8                     # f32 sublane tile; rank rows are padded to this
RES_OFF = 64                 # lane offset of the residual block in the fused RHS
LN_EPS = 1e-5


# ----------------------------------------------------------------------------
# Fused kernel: all (year, relation) branches + folded final conv + LSTM + Linear
# ----------------------------------------------------------------------------
def fused_kernel(x_ref, wcr_ref, scal_ref, wbig_ref, cbig_ref,
                 whh_ref, wlin_ref, blin_ref, out_ref):
    # x_ref   : VMEM (RPAD, LANE)     gathered rank rows; features in lanes [0, Y*F)
    # wcr_ref : VMEM (LANE, LANE)     fused cheb|resid block-diagonal weights
    # scal_ref: VMEM (6, RPAD, LANE)  pre-broadcast rows: cheb_b, tw_c, time_b,
    #                                 res_b, gamma*rsqrt(eps), beta
    # wbig_ref: VMEM (LANE, T*GATE)   final 1x1 conv folded into LSTM input projection
    # cbig_ref: VMEM (RPAD, T*GATE)   folded bias (fin_b @ Wih + b_ih + b_hh) per step
    # whh_ref : VMEM (LANE, GATE)     W_hh^T padded to 128 rows, gate order [i,f,o,g]
    # wlin_ref: VMEM (LANE, PPAD)     W_linear^T padded to 128 rows / PPAD lanes
    # blin_ref: VMEM (RPAD, PPAD)
    # out_ref : VMEM (RPAD, PPAD)
    x = x_ref[...]

    # ---- all Y*SUPPORT MSTGCN branches with ONE MXU push -------------------------
    # cheb block sits at lanes [0, B); resid block at lanes [RES_OFF, RES_OFF + B).
    y = jnp.dot(x, wcr_ref[...], preferred_element_type=jnp.float32)   # (RPAD, 128)
    y_res = pltpu.roll(y, RES_OFF, 1)        # resid block realigned to lanes [0, B)

    cheb_b, tw_c, time_b = scal_ref[0], scal_ref[1], scal_ref[2]
    res_b, g_scaled, beta = scal_ref[3], scal_ref[4], scal_ref[5]

    cheb = jnp.maximum(y + cheb_b, 0.0)
    resid = y_res + res_b
    z = jnp.maximum(resid + tw_c * cheb + time_b, 0.0)      # (RPAD, 128)

    # LayerNorm over the size-1 nb_time_filter axis: mean == z so (z - mean) == 0
    # exactly and the result equals beta bit-for-bit.  g_scaled = gamma * rsqrt(eps)
    # is precomputed, so no EUP rsqrt sits on the critical path.
    ln = (z - z) * g_scaled + beta                           # (RPAD, 128)

    # ---- final 1x1 conv (1->HIDDEN) fused with the LSTM input projection, all T ----
    xp = jnp.dot(ln, wbig_ref[...], preferred_element_type=jnp.float32) + cbig_ref[...]

    # ---- LSTM(20 -> 32): gates packed [i, f, o, g], everything stays 128-lane wide ----
    lane = jax.lax.broadcasted_iota(jnp.int32, (RPAD, GATE), 1)
    tanh_lanes = lane >= 3 * LSTM_HID                        # the g (cell) gate
    whh = whh_ref[...]
    h = jnp.zeros((RPAD, GATE), jnp.float32)
    c = jnp.zeros((RPAD, GATE), jnp.float32)
    # TODO(synk): switch to lax.fori_loop(..., unroll=True) if TRAIN_YEAR ever grows.
    for t in range(TRAIN_YEAR):
        gates = xp[:, t * GATE:(t + 1) * GATE] + jnp.dot(
            h, whh, preferred_element_type=jnp.float32)      # (RPAD, 128), vreg-aligned
        act = jnp.where(tanh_lanes, jnp.tanh(gates), jax.nn.sigmoid(gates))
        i_v = act                                            # i already at lanes [0, 32)
        f_v = pltpu.roll(act, 96, 1)                         # f: lanes [32, 64) -> [0, 32)
        o_v = pltpu.roll(act, 64, 1)                         # o: lanes [64, 96) -> [0, 32)
        g_v = pltpu.roll(act, 32, 1)                         # g: lanes [96,128) -> [0, 32)
        c = f_v * c + i_v * g_v            # lanes [0,32) real; rest bounded junk
        h = o_v * jnp.tanh(c)              # junk lanes later hit zero rows of whh/wlin

    # ---- ReLU + Linear(32 -> periods); dense (RPAD, PPAD) store --------------------
    h = jnp.maximum(h, 0.0)
    out_ref[...] = jnp.dot(h, wlin_ref[...],
                           preferred_element_type=jnp.float32) + blin_ref[...]


@functools.partial(jax.jit, static_argnames=("periods",))
def temporal_gnn_forward(feature_list, rank, packed, *, periods):
    # edge_list is intentionally not an argument: ChebConv with K=1 ignores edges.
    Y, N, F = feature_list.shape
    R = rank.shape[0]
    assert R <= RPAD, "TODO(synk): enlarge RPAD packing / add a row grid for larger rank"
    PPAD = packed["blin"].shape[1]

    # Wrapper-side gather of only the R rank rows (per-node GNN branches commute with
    # the gather, so this is exact): no N-row DMA, no in-kernel gather on the prologue.
    feat_r = jnp.transpose(feature_list[:, rank, :], (1, 0, 2)).reshape(R, Y * F)
    x = jnp.zeros((RPAD, LANE), jnp.float32).at[:R, :Y * F].set(feat_r)

    flops = 2 * RPAD * (LANE * LANE + LANE * TRAIN_YEAR * GATE
                        + TRAIN_YEAR * GATE * GATE + LANE * PPAD)
    transcend = RPAD * TRAIN_YEAR * 3 * GATE
    bytes_acc = 4 * (x.size + sum(int(v.size) for v in packed.values()) + RPAD * PPAD)

    vmem = pl.BlockSpec(memory_space=pltpu.MemorySpace.VMEM)
    # TODO(synk): if R grows, add a row grid (M tile 256 on v6e/v7x, 128 on v5e) with
    # dimension_semantics=("parallel",) so v7x can use both TensorCores.
    out = pl.pallas_call(
        fused_kernel,
        out_shape=jax.ShapeDtypeStruct((RPAD, PPAD), jnp.float32),
        in_specs=[vmem] * 8,
        out_specs=vmem,
        compiler_params=pltpu.CompilerParams(vmem_limit_bytes=32 * 1024 * 1024),
        cost_estimate=pl.CostEstimate(flops=flops, transcendentals=transcend,
                                      bytes_accessed=bytes_acc),
    )(x, packed["wcr"], packed["scal"], packed["wbig"], packed["cbig"],
      packed["whh"], packed["wlin"], packed["blin"])
    return out[:R, :periods]


# ----------------------------------------------------------------------------
# Parameters: raw (PyTorch-layout) + packed (kernel-layout)
# ----------------------------------------------------------------------------
def init_raw_params(key, periods):
    ks = jax.random.split(key, 16)
    Yr = (TRAIN_YEAR, SUPPORT)
    s = 0.5
    f32 = jnp.float32
    return dict(
        cheb_w=(jax.random.normal(ks[0], Yr + (NODE_FEAT,)) * s).astype(f32),
        cheb_b=(jax.random.normal(ks[1], Yr) * 0.1).astype(f32),
        time_w=(jax.random.normal(ks[2], Yr + (3,)) * s).astype(f32),     # 1x3 taps
        time_b=(jax.random.normal(ks[3], Yr) * 0.1).astype(f32),
        res_w=(jax.random.normal(ks[4], Yr + (NODE_FEAT,)) * s).astype(f32),
        res_b=(jax.random.normal(ks[5], Yr) * 0.1).astype(f32),
        ln_gamma=(1.0 + jax.random.normal(ks[6], Yr) * 0.1).astype(f32),
        ln_beta=(jax.random.normal(ks[7], Yr) * 0.1).astype(f32),
        fin_w=(jax.random.normal(ks[8], Yr + (HIDDEN,)) * s).astype(f32),
        fin_b=(jax.random.normal(ks[9], Yr + (HIDDEN,)) * 0.1).astype(f32),
        wih=(jax.random.normal(ks[10], (GATE, LSTM_IN)) * 0.2).astype(f32),   # [i,f,g,o]
        whh=(jax.random.normal(ks[11], (GATE, LSTM_HID)) * 0.2).astype(f32),
        b_ih=(jax.random.normal(ks[12], (GATE,)) * 0.1).astype(f32),
        b_hh=(jax.random.normal(ks[13], (GATE,)) * 0.05).astype(f32),
        wlin=(jax.random.normal(ks[14], (periods, LSTM_HID)) * 0.2).astype(f32),
        blin=(jax.random.normal(ks[15], (periods,)) * 0.1).astype(f32),
    )


def pack_params(raw):
    Y, Rel, F, H = TRAIN_YEAR, SUPPORT, NODE_FEAT, HIDDEN
    B = Y * Rel                      # 25 (year, relation) branches
    YF = Y * F                       # 20 lanes of real features
    P = raw["wlin"].shape[0]
    PPAD = ((P + LANE - 1) // LANE) * LANE
    f32 = jnp.float32
    eye_y = jnp.eye(Y, dtype=f32)

    # Block-diagonal per-year weights: W[y*F+f, t*Rel+r] = w[y, r, f] * (y == t).
    wc = jnp.einsum('yrf,yt->yftr', raw["cheb_w"], eye_y).reshape(YF, B)
    wr = jnp.einsum('yrf,yt->yftr', raw["res_w"], eye_y).reshape(YF, B)
    # Fuse cheb + resid into one (LANE, LANE) RHS -> a single MXU push in the kernel:
    # cheb block at lanes [0, B), resid block at lanes [RES_OFF, RES_OFF + B).
    wcr = (jnp.zeros((LANE, LANE), f32)
           .at[:YF, 0:B].set(wc)
           .at[:YF, RES_OFF:RES_OFF + B].set(wr))

    # Scalar rows: lane-padded to 128 and pre-broadcast to RPAD sublanes so the kernel
    # only touches full vregs (no sub-vreg sublane slices / relayouts).
    def brow(v):
        r = jnp.zeros((LANE,), f32).at[:B].set(v.reshape(B).astype(f32))
        return jnp.broadcast_to(r, (RPAD, LANE))

    scal = jnp.stack([
        brow(raw["cheb_b"]),
        brow(raw["time_w"][:, :, 1]),            # only the center tap sees real data
        brow(raw["time_b"]),
        brow(raw["res_b"]),
        brow(raw["ln_gamma"] / jnp.sqrt(jnp.float32(LN_EPS))),   # gamma * rsqrt(eps)
        brow(raw["ln_beta"]),
    ], axis=0)                                   # (6, RPAD, LANE)

    # LSTM gate reorder [i, f, g, o] -> [i, f, o, g] so the tanh gate is lane-contiguous.
    idx = jnp.arange(LSTM_HID)
    perm = jnp.concatenate([idx, idx + LSTM_HID, idx + 3 * LSTM_HID, idx + 2 * LSTM_HID])
    wih_t = raw["wih"][perm, :].T                # (20, 128)
    whh_t = raw["whh"][perm, :].T                # (32, 128)
    b_ro = (raw["b_ih"] + raw["b_hh"])[perm]     # (128,)
    whh = jnp.zeros((LANE, GATE), f32).at[:LSTM_HID].set(whh_t)   # h stays 128-lane wide

    # Fold the final 1x1 conv (1 -> HIDDEN) into the LSTM input projection:
    #   x2[:, t, r*H + h] = ln[:, t*Rel + r] * fin_w[t, r, h] + fin_b[t, r, h]
    #   x2_t @ Wih_t + b  ==  ln_t @ Wfold_t + Cfold_t
    wih_rhk = wih_t.reshape(Rel, H, GATE)
    wfold = jnp.einsum('yrh,rhk->yrk', raw["fin_w"], wih_rhk)               # (Y, Rel, 128)
    wbig25 = jnp.einsum('yrk,yt->yrtk', wfold, eye_y).reshape(B, Y * GATE)  # (25, 640)
    wbig = jnp.zeros((LANE, Y * GATE), f32).at[:B].set(wbig25)              # (128, 640)
    cbig_row = (jnp.einsum('trh,rhk->tk', raw["fin_b"], wih_rhk)
                + b_ro[None, :]).reshape(1, Y * GATE)
    cbig = jnp.broadcast_to(cbig_row, (RPAD, Y * GATE))                     # (8, 640)

    wlin = jnp.zeros((LANE, PPAD), f32).at[:LSTM_HID, :P].set(raw["wlin"].T)
    blin = jnp.zeros((RPAD, PPAD), f32).at[:, :P].set(
        jnp.broadcast_to(raw["blin"][None, :], (RPAD, P)))

    return dict(wcr=wcr, scal=scal, wbig=wbig, cbig=jnp.asarray(cbig),
                whh=whh, wlin=wlin, blin=blin)


# ----------------------------------------------------------------------------
# Pure-JAX reference of the original module semantics (PyTorch param layout)
# ----------------------------------------------------------------------------
def ref_forward(feature_list, rank, raw):
    Y, N, _ = feature_list.shape
    years = []
    for y in range(Y):
        x = feature_list[y]
        branches = []
        for r in range(SUPPORT):
            cheb = jnp.maximum(x @ raw["cheb_w"][y, r] + raw["cheb_b"][y, r], 0.0)[:, None]
            timec = raw["time_w"][y, r, 1] * cheb + raw["time_b"][y, r]
            resid = (x @ raw["res_w"][y, r] + raw["res_b"][y, r])[:, None]
            z = jnp.maximum(resid + timec, 0.0)
            mu = jnp.mean(z, axis=-1, keepdims=True)
            var = jnp.mean((z - mu) ** 2, axis=-1, keepdims=True)
            ln = (z - mu) / jnp.sqrt(var + LN_EPS) * raw["ln_gamma"][y, r] + raw["ln_beta"][y, r]
            branches.append(ln * raw["fin_w"][y, r][None, :] + raw["fin_b"][y, r][None, :])
        years.append(jnp.concatenate(branches, axis=1))
    feats = jnp.stack(years, axis=0)                      # (Y, N, 20)
    x2 = jnp.transpose(feats[:, rank, :], (1, 0, 2))      # (R, T, 20)

    b = raw["b_ih"] + raw["b_hh"]
    h = jnp.zeros((x2.shape[0], LSTM_HID), jnp.float32)
    c = jnp.zeros_like(h)
    for t in range(TRAIN_YEAR):
        gates = x2[:, t, :] @ raw["wih"].T + h @ raw["whh"].T + b
        i = jax.nn.sigmoid(gates[:, 0:32])
        f = jax.nn.sigmoid(gates[:, 32:64])
        g = jnp.tanh(gates[:, 64:96])
        o = jax.nn.sigmoid(gates[:, 96:128])
        c = f * c + i * g
        h = o * jnp.tanh(c)
    h = jnp.maximum(h, 0.0)
    return h @ raw["wlin"].T + raw["blin"]


def check_packing(raw, packed, feature_list, key):
    """The degenerate LayerNorm (ln == beta) makes the end-to-end test blind to the
    wc/wr block-diagonal packing and the fin_w/Wih fold; validate them directly."""
    Y, Rel, F, H = TRAIN_YEAR, SUPPORT, NODE_FEAT, HIDDEN
    B = Y * Rel
    YF = Y * F
    N = feature_list.shape[1]

    # (a) block-diagonal cheb/resid weights reproduce the per-branch pre-LN activations
    x_nm = jnp.transpose(feature_list, (1, 0, 2)).reshape(N, YF)
    wc = packed["wcr"][:YF, 0:B]
    wr = packed["wcr"][:YF, RES_OFF:RES_OFF + B]
    s = packed["scal"][:, 0, :B]
    cheb = jnp.maximum(x_nm @ wc + s[0], 0.0)
    z_pack = jnp.maximum((x_nm @ wr + s[3]) + s[1] * cheb + s[2], 0.0)
    cols = []
    for y in range(Y):
        xy = feature_list[y]
        for r in range(Rel):
            ch = jnp.maximum(xy @ raw["cheb_w"][y, r] + raw["cheb_b"][y, r], 0.0)
            rs = xy @ raw["res_w"][y, r] + raw["res_b"][y, r]
            cols.append(jnp.maximum(rs + raw["time_w"][y, r, 1] * ch + raw["time_b"][y, r], 0.0))
    z_ref = jnp.stack(cols, axis=1)
    assert jnp.allclose(z_pack, z_ref, rtol=1e-4, atol=1e-4)

    # (b) the final-conv fold reproduces (final conv -> hstack -> LSTM input projection)
    idx = jnp.arange(LSTM_HID)
    perm = jnp.concatenate([idx, idx + LSTM_HID, idx + 3 * LSTM_HID, idx + 2 * LSTM_HID])
    wih_t = raw["wih"][perm, :].T
    b_ro = (raw["b_ih"] + raw["b_hh"])[perm]
    L = jax.random.normal(key, (4, B)).astype(jnp.float32)
    Lp = jnp.zeros((4, LANE), jnp.float32).at[:, :B].set(L)
    xp_pack = Lp @ packed["wbig"] + packed["cbig"][0]
    parts = []
    for t in range(Y):
        x2t = (L[:, t * Rel:(t + 1) * Rel, None] * raw["fin_w"][t][None]
               + raw["fin_b"][t][None]).reshape(4, Rel * H)
        parts.append(x2t @ wih_t + b_ro)
    xp_ref = jnp.concatenate(parts, axis=1)
    assert jnp.allclose(xp_pack, xp_ref, rtol=1e-4, atol=1e-4)


if __name__ == "__main__":
    N_NODES = 16
    PERIODS = 8

    key = jax.random.PRNGKey(0)
    k_feat, k_param, k_chk = jax.random.split(key, 3)

    # feature_list: one (N, 4) feature matrix per training year.
    feature_list = jax.random.normal(
        k_feat, (TRAIN_YEAR, N_NODES, NODE_FEAT)).astype(jnp.float32)
    # edge_list placeholder: ChebConv(K=1) never reads the edges, so it is unused.
    edge_list = jnp.zeros((TRAIN_YEAR, SUPPORT, 2, 4), jnp.int32)  # noqa: F841
    rank = jnp.array([0, 3, 5, 7], dtype=jnp.int32)

    raw = init_raw_params(k_param, PERIODS)
    packed = pack_params(raw)

    out = temporal_gnn_forward(feature_list, rank, packed, periods=PERIODS)
    jax.block_until_ready(out)

    ref = ref_forward(feature_list, rank, raw)
    assert out.shape == (rank.shape[0], PERIODS)
    assert jnp.allclose(out, ref, rtol=1e-3, atol=1e-3), (out, ref)

    # Validate the parameter packings the end-to-end test cannot see (degenerate LN).
    check_packing(raw, packed, feature_list, k_chk)

    print("KERNEL_OK")
</pallas_src>

<mosaic_0001>
module attributes {stable_mosaic.version = 11 : i64} {
  func.func @fused_kernel(%arg0: memref<8x128xf32, #tpu.memory_space<vmem>>, %arg1: memref<128x128xf32, #tpu.memory_space<vmem>>, %arg2: memref<6x8x128xf32, #tpu.memory_space<vmem>>, %arg3: memref<128x640xf32, #tpu.memory_space<vmem>>, %arg4: memref<8x640xf32, #tpu.memory_space<vmem>>, %arg5: memref<128x128xf32, #tpu.memory_space<vmem>>, %arg6: memref<128x128xf32, #tpu.memory_space<vmem>>, %arg7: memref<8x128xf32, #tpu.memory_space<vmem>>, %arg8: memref<8x128xf32, #tpu.memory_space<vmem>>) attributes {dimension_semantics = [], scalar_prefetch = 0 : i64, scratch_operands = 0 : i64, tpu.core_type = #tpu.core_type<tc>} {
    %c0 = arith.constant 0 : index
    %c0_0 = arith.constant 0 : index
    %0 = vector.load %arg0[%c0, %c0_0] : memref<8x128xf32, #tpu.memory_space<vmem>>, vector<8x128xf32>
    %c0_1 = arith.constant 0 : index
    %c0_2 = arith.constant 0 : index
    %1 = vector.load %arg1[%c0_1, %c0_2] : memref<128x128xf32, #tpu.memory_space<vmem>>, vector<128x128xf32>
    %cst = arith.constant dense<0.000000e+00> : vector<8x128xf32>
    %2 = tpu.matmul %0, %1, %cst {dimension_numbers = #tpu.dot_dimension_numbers<[1], [0], [0], [1], [0, 0, 1, 1], [], []>} : vector<8x128xf32>, vector<128x128xf32>, vector<8x128xf32> -> vector<8x128xf32>
    %c64_i32 = arith.constant 64 : i32
    %3 = tpu.dynamic_rotate %2 by %c64_i32 dim 1 : vector<8x128xf32>, i32 -> vector<8x128xf32>
    %c0_3 = arith.constant 0 : index
    %c0_4 = arith.constant 0 : index
    %c0_5 = arith.constant 0 : index
    %4 = vector.load %arg2[%c0_3, %c0_4, %c0_5] : memref<6x8x128xf32, #tpu.memory_space<vmem>>, vector<1x8x128xf32>
    %5 = vector.shape_cast %4 : vector<1x8x128xf32> to vector<8x128xf32>
    %c1 = arith.constant 1 : index
    %c0_6 = arith.constant 0 : index
    %c0_7 = arith.constant 0 : index
    %6 = vector.load %arg2[%c1, %c0_6, %c0_7] : memref<6x8x128xf32, #tpu.memory_space<vmem>>, vector<1x8x128xf32>
    %7 = vector.shape_cast %6 : vector<1x8x128xf32> to vector<8x128xf32>
    %c2 = arith.constant 2 : index
    %c0_8 = arith.constant 0 : index
    %c0_9 = arith.constant 0 : index
    %8 = vector.load %arg2[%c2, %c0_8, %c0_9] : memref<6x8x128xf32, #tpu.memory_space<vmem>>, vector<1x8x128xf32>
    %9 = vector.shape_cast %8 : vector<1x8x128xf32> to vector<8x128xf32>
    %c3 = arith.constant 3 : index
    %c0_10 = arith.constant 0 : index
    %c0_11 = arith.constant 0 : index
    %10 = vector.load %arg2[%c3, %c0_10, %c0_11] : memref<6x8x128xf32, #tpu.memory_space<vmem>>, vector<1x8x128xf32>
    %11 = vector.shape_cast %10 : vector<1x8x128xf32> to vector<8x128xf32>
    %c4 = arith.constant 4 : index
    %c0_12 = arith.constant 0 : index
    %c0_13 = arith.constant 0 : index
    %12 = vector.load %arg2[%c4, %c0_12, %c0_13] : memref<6x8x128xf32, #tpu.memory_space<vmem>>, vector<1x8x128xf32>
    %13 = vector.shape_cast %12 : vector<1x8x128xf32> to vector<8x128xf32>
    %c5 = arith.constant 5 : index
    %c0_14 = arith.constant 0 : index
    %c0_15 = arith.constant 0 : index
    %14 = vector.load %arg2[%c5, %c0_14, %c0_15] : memref<6x8x128xf32, #tpu.memory_space<vmem>>, vector<1x8x128xf32>
    %15 = vector.shape_cast %14 : vector<1x8x128xf32> to vector<8x128xf32>
    %16 = arith.addf %2, %5 : vector<8x128xf32>
    %cst_16 = arith.constant 0.000000e+00 : f32
    %17 = vector.broadcast %cst_16 : f32 to vector<8x128xf32>
    %18 = arith.maximumf %16, %17 : vector<8x128xf32>
    %19 = arith.addf %3, %11 : vector<8x128xf32>
    %20 = arith.mulf %7, %18 : vector<8x128xf32>
    %21 = arith.addf %19, %20 : vector<8x128xf32>
    %22 = arith.addf %21, %9 : vector<8x128xf32>
    %cst_17 = arith.constant 0.000000e+00 : f32
    %23 = vector.broadcast %cst_17 : f32 to vector<8x128xf32>
    %24 = arith.maximumf %22, %23 : vector<8x128xf32>
    %25 = arith.subf %24, %24 : vector<8x128xf32>
    %26 = arith.mulf %25, %13 : vector<8x128xf32>
    %27 = arith.addf %26, %15 : vector<8x128xf32>
    %c0_18 = arith.constant 0 : index
    %c0_19 = arith.constant 0 : index
    %28 = vector.load %arg3[%c0_18, %c0_19] : memref<128x640xf32, #tpu.memory_space<vmem>>, vector<128x640xf32>
    %cst_20 = arith.constant dense<0.000000e+00> : vector<8x640xf32>
    %29 = tpu.matmul %27, %28, %cst_20 {dimension_numbers = #tpu.dot_dimension_numbers<[1], [0], [0], [1], [0, 0, 1, 1], [], []>} : vector<8x128xf32>, vector<128x640xf32>, vector<8x640xf32> -> vector<8x640xf32>
    %c0_21 = arith.constant 0 : index
    %c0_22 = arith.constant 0 : index
    %30 = vector.load %arg4[%c0_21, %c0_22] : memref<8x640xf32, #tpu.memory_space<vmem>>, vector<8x640xf32>
    %31 = arith.addf %29, %30 : vector<8x640xf32>
    %32 = tpu.iota {dimensions = array<i32: 1>} : vector<8x128xi32>
    %c96_i32 = arith.constant 96 : i32
    %33 = vector.broadcast %c96_i32 : i32 to vector<8x128xi32>
    %34 = arith.cmpi sge, %32, %33 : vector<8x128xi32>
    %c0_23 = arith.constant 0 : index
    %c0_24 = arith.constant 0 : index
    %35 = vector.load %arg5[%c0_23, %c0_24] : memref<128x128xf32, #tpu.memory_space<vmem>>, vector<128x128xf32>
    %cst_25 = arith.constant 0.000000e+00 : f32
    %36 = vector.broadcast %cst_25 : f32 to vector<8x128xf32>
    %cst_26 = arith.constant 0.000000e+00 : f32
    %37 = vector.broadcast %cst_26 : f32 to vector<8x128xf32>
    %38 = vector.extract_strided_slice %31 {offsets = [0, 0], sizes = [8, 128], strides = [1, 1]} : vector<8x640xf32> to vector<8x128xf32>
    %cst_27 = arith.constant dense<0.000000e+00> : vector<8x128xf32>
    %39 = tpu.matmul %36, %35, %cst_27 {dimension_numbers = #tpu.dot_dimension_numbers<[1], [0], [0], [1], [0, 0, 1, 1], [], []>} : vector<8x128xf32>, vector<128x128xf32>, vector<8x128xf32> -> vector<8x128xf32>
    %40 = arith.addf %38, %39 : vector<8x128xf32>
    %41 = math.tanh %40 : vector<8x128xf32>
    %42 = arith.negf %40 : vector<8x128xf32>
    %43 = math.exp %42 : vector<8x128xf32>
    %cst_28 = arith.constant 1.000000e+00 : f32
    %44 = vector.broadcast %cst_28 : f32 to vector<8x128xf32>
    %45 = arith.addf %44, %43 : vector<8x128xf32>
    %46 = arith.divf %44, %45 : vector<8x128xf32>
    %47 = arith.select %34, %41, %46 : vector<8x128xi1>, vector<8x128xf32>
    %c96_i32_29 = arith.constant 96 : i32
    %48 = tpu.dynamic_rotate %47 by %c96_i32_29 dim 1 : vector<8x128xf32>, i32 -> vector<8x128xf32>
    %c64_i32_30 = arith.constant 64 : i32
    %49 = tpu.dynamic_rotate %47 by %c64_i32_30 dim 1 : vector<8x128xf32>, i32 -> vector<8x128xf32>
    %c32_i32 = arith.constant 32 : i32
    %50 = tpu.dynamic_rotate %47 by %c32_i32 dim 1 : vector<8x128xf32>, i32 -> vector<8x128xf32>
    %51 = arith.mulf %48, %37 : vector<8x128xf32>
    %52 = arith.mulf %47, %50 : vector<8x128xf32>
    %53 = arith.addf %51, %52 : vector<8x128xf32>
    %54 = math.tanh %53 : vector<8x128xf32>
    %55 = arith.mulf %49, %54 : vector<8x128xf32>
    %56 = vector.extract_strided_slice %31 {offsets = [0, 128], sizes = [8, 128], strides = [1, 1]} : vector<8x640xf32> to vector<8x128xf32>
    %cst_31 = arith.constant dense<0.000000e+00> : vector<8x128xf32>
    %57 = tpu.matmul %55, %35, %cst_31 {dimension_numbers = #tpu.dot_dimension_numbers<[1], [0], [0], [1], [0, 0, 1, 1], [], []>} : vector<8x128xf32>, vector<128x128xf32>, vector<8x128xf32> -> vector<8x128xf32>
    %58 = arith.addf %56, %57 : vector<8x128xf32>
    %59 = math.tanh %58 : vector<8x128xf32>
    %60 = arith.negf %58 : vector<8x128xf32>
    %61 = math.exp %60 : vector<8x128xf32>
    %cst_32 = arith.constant 1.000000e+00 : f32
    %62 = vector.broadcast %cst_32 : f32 to vector<8x128xf32>
    %63 = arith.addf %62, %61 : vector<8x128xf32>
    %64 = arith.divf %62, %63 : vector<8x128xf32>
    %65 = arith.select %34, %59, %64 : vector<8x128xi1>, vector<8x128xf32>
    %c96_i32_33 = arith.constant 96 : i32
    %66 = tpu.dynamic_rotate %65 by %c96_i32_33 dim 1 : vector<8x128xf32>, i32 -> vector<8x128xf32>
    %c64_i32_34 = arith.constant 64 : i32
    %67 = tpu.dynamic_rotate %65 by %c64_i32_34 dim 1 : vector<8x128xf32>, i32 -> vector<8x128xf32>
    %c32_i32_35 = arith.constant 32 : i32
    %68 = tpu.dynamic_rotate %65 by %c32_i32_35 dim 1 : vector<8x128xf32>, i32 -> vector<8x128xf32>
    %69 = arith.mulf %66, %53 : vector<8x128xf32>
    %70 = arith.mulf %65, %68 : vector<8x128xf32>
    %71 = arith.addf %69, %70 : vector<8x128xf32>
    %72 = math.tanh %71 : vector<8x128xf32>
    %73 = arith.mulf %67, %72 : vector<8x128xf32>
    %74 = vector.extract_strided_slice %31 {offsets = [0, 256], sizes = [8, 128], strides = [1, 1]} : vector<8x640xf32> to vector<8x128xf32>
    %cst_36 = arith.constant dense<0.000000e+00> : vector<8x128xf32>
    %75 = tpu.matmul %73, %35, %cst_36 {dimension_numbers = #tpu.dot_dimension_numbers<[1], [0], [0], [1], [0, 0, 1, 1], [], []>} : vector<8x128xf32>, vector<128x128xf32>, vector<8x128xf32> -> vector<8x128xf32>
    %76 = arith.addf %74, %75 : vector<8x128xf32>
    %77 = math.tanh %76 : vector<8x128xf32>
    %78 = arith.negf %76 : vector<8x128xf32>
    %79 = math.exp %78 : vector<8x128xf32>
    %cst_37 = arith.constant 1.000000e+00 : f32
    %80 = vector.broadcast %cst_37 : f32 to vector<8x128xf32>
    %81 = arith.addf %80, %79 : vector<8x128xf32>
    %82 = arith.divf %80, %81 : vector<8x128xf32>
    %83 = arith.select %34, %77, %82 : vector<8x128xi1>, vector<8x128xf32>
    %c96_i32_38 = arith.constant 96 : i32
    %84 = tpu.dynamic_rotate %83 by %c96_i32_38 dim 1 : vector<8x128xf32>, i32 -> vector<8x128xf32>
    %c64_i32_39 = arith.constant 64 : i32
    %85 = tpu.dynamic_rotate %83 by %c64_i32_39 dim 1 : vector<8x128xf32>, i32 -> vector<8x128xf32>
    %c32_i32_40 = arith.constant 32 : i32
    %86 = tpu.dynamic_rotate %83 by %c32_i32_40 dim 1 : vector<8x128xf32>, i32 -> vector<8x128xf32>
    %87 = arith.mulf %84, %71 : vector<8x128xf32>
    %88 = arith.mulf %83, %86 : vector<8x128xf32>
    %89 = arith.addf %87, %88 : vector<8x128xf32>
    %90 = math.tanh %89 : vector<8x128xf32>
    %91 = arith.mulf %85, %90 : vector<8x128xf32>
    %92 = vector.extract_strided_slice %31 {offsets = [0, 384], sizes = [8, 128], strides = [1, 1]} : vector<8x640xf32> to vector<8x128xf32>
    %cst_41 = arith.constant dense<0.000000e+00> : vector<8x128xf32>
    %93 = tpu.matmul %91, %35, %cst_41 {dimension_numbers = #tpu.dot_dimension_numbers<[1], [0], [0], [1], [0, 0, 1, 1], [], []>} : vector<8x128xf32>, vector<128x128xf32>, vector<8x128xf32> -> vector<8x128xf32>
    %94 = arith.addf %92, %93 : vector<8x128xf32>
    %95 = math.tanh %94 : vector<8x128xf32>
    %96 = arith.negf %94 : vector<8x128xf32>
    %97 = math.exp %96 : vector<8x128xf32>
    %cst_42 = arith.constant 1.000000e+00 : f32
    %98 = vector.broadcast %cst_42 : f32 to vector<8x128xf32>
    %99 = arith.addf %98, %97 : vector<8x128xf32>
    %100 = arith.divf %98, %99 : vector<8x128xf32>
    %101 = arith.select %34, %95, %100 : vector<8x128xi1>, vector<8x128xf32>
    %c96_i32_43 = arith.constant 96 : i32
    %102 = tpu.dynamic_rotate %101 by %c96_i32_43 dim 1 : vector<8x128xf32>, i32 -> vector<8x128xf32>
    %c64_i32_44 = arith.constant 64 : i32
    %103 = tpu.dynamic_rotate %101 by %c64_i32_44 dim 1 : vector<8x128xf32>, i32 -> vector<8x128xf32>
    %c32_i32_45 = arith.constant 32 : i32
    %104 = tpu.dynamic_rotate %101 by %c32_i32_45 dim 1 : vector<8x128xf32>, i32 -> vector<8x128xf32>
    %105 = arith.mulf %102, %89 : vector<8x128xf32>
    %106 = arith.mulf %101, %104 : vector<8x128xf32>
    %107 = arith.addf %105, %106 : vector<8x128xf32>
    %108 = math.tanh %107 : vector<8x128xf32>
    %109 = arith.mulf %103, %108 : vector<8x128xf32>
    %110 = vector.extract_strided_slice %31 {offsets = [0, 512], sizes = [8, 128], strides = [1, 1]} : vector<8x640xf32> to vector<8x128xf32>
    %cst_46 = arith.constant dense<0.000000e+00> : vector<8x128xf32>
    %111 = tpu.matmul %109, %35, %cst_46 {dimension_numbers = #tpu.dot_dimension_numbers<[1], [0], [0], [1], [0, 0, 1, 1], [], []>} : vector<8x128xf32>, vector<128x128xf32>, vector<8x128xf32> -> vector<8x128xf32>
    %112 = arith.addf %110, %111 : vector<8x128xf32>
    %113 = math.tanh %112 : vector<8x128xf32>
    %114 = arith.negf %112 : vector<8x128xf32>
    %115 = math.exp %114 : vector<8x128xf32>
    %cst_47 = arith.constant 1.000000e+00 : f32
    %116 = vector.broadcast %cst_47 : f32 to vector<8x128xf32>
    %117 = arith.addf %116, %115 : vector<8x128xf32>
    %118 = arith.divf %116, %117 : vector<8x128xf32>
    %119 = arith.select %34, %113, %118 : vector<8x128xi1>, vector<8x128xf32>
    %c96_i32_48 = arith.constant 96 : i32
    %120 = tpu.dynamic_rotate %119 by %c96_i32_48 dim 1 : vector<8x128xf32>, i32 -> vector<8x128xf32>
    %c64_i32_49 = arith.constant 64 : i32
    %121 = tpu.dynamic_rotate %119 by %c64_i32_49 dim 1 : vector<8x128xf32>, i32 -> vector<8x128xf32>
    %c32_i32_50 = arith.constant 32 : i32
    %122 = tpu.dynamic_rotate %119 by %c32_i32_50 dim 1 : vector<8x128xf32>, i32 -> vector<8x128xf32>
    %123 = arith.mulf %120, %107 : vector<8x128xf32>
    %124 = arith.mulf %119, %122 : vector<8x128xf32>
    %125 = arith.addf %123, %124 : vector<8x128xf32>
    %126 = math.tanh %125 : vector<8x128xf32>
    %127 = arith.mulf %121, %126 : vector<8x128xf32>
    %cst_51 = arith.constant 0.000000e+00 : f32
    %128 = vector.broadcast %cst_51 : f32 to vector<8x128xf32>
    %129 = arith.maximumf %127, %128 : vector<8x128xf32>
    %c0_52 = arith.constant 0 : index
    %c0_53 = arith.constant 0 : index
    %130 = vector.load %arg6[%c0_52, %c0_53] : memref<128x128xf32, #tpu.memory_space<vmem>>, vector<128x128xf32>
    %cst_54 = arith.constant dense<0.000000e+00> : vector<8x128xf32>
    %131 = tpu.matmul %129, %130, %cst_54 {dimension_numbers = #tpu.dot_dimension_numbers<[1], [0], [0], [1], [0, 0, 1, 1], [], []>} : vector<8x128xf32>, vector<128x128xf32>, vector<8x128xf32> -> vector<8x128xf32>
    %c0_55 = arith.constant 0 : index
    %c0_56 = arith.constant 0 : index
    %132 = vector.load %arg7[%c0_55, %c0_56] : memref<8x128xf32, #tpu.memory_space<vmem>>, vector<8x128xf32>
    %133 = arith.addf %131, %132 : vector<8x128xf32>
    %c0_57 = arith.constant 0 : index
    %c0_58 = arith.constant 0 : index
    %134 = vector.load %arg8[%c0_57, %c0_58] : memref<8x128xf32, #tpu.memory_space<vmem>>, vector<8x128xf32>
    tpu.vector_store %arg8[%c0_57, %c0_58], %133 {strides = array<i32>} : memref<8x128xf32, #tpu.memory_space<vmem>>, vector<8x128xf32>,
    return
  }
}

</mosaic_0001>

<bundles_post_ra>
// kernel: temporal_gnn_forward.1
= control target key start
LH: loop header
LB: loop body
LE: loop exit
PB: predicated region body
PF: predicated region fallthrough
CT: control target
= control target key end

     0   :  { %13 = vsyncpa [#allocation3], 0  ;;  %s2321_s0 = inlined_call_operand.vmem [shape: f32[8,128], index: 0, kind: input, shape index: {}]   ;;  %s2322_s1 = inlined_call_operand.vmem [shape: f32[128,128], index: 1, kind: input, shape index: {}]   ;;  %s2323_s2 = inlined_call_operand.hbm [shape: f32[6,8,128], index: 2, kind: input, shape index: {}]   ;;  %s2324_s3 = inlined_call_operand.hbm [shape: f32[128,640], index: 3, kind: input, shape index: {}]   ;;  %s2325_s4 = inlined_call_operand.hbm [shape: f32[8,640], index: 4, kind: input, shape index: {}]   ;;  %s2326_s5 = inlined_call_operand.vmem [shape: f32[128,128], index: 5, kind: input, shape index: {}]   ;;  %s2327_s6 = inlined_call_operand.hbm [shape: f32[128,128], index: 6, kind: input, shape index: {}]   ;;  %s2328_s7 = inlined_call_operand.hbm [shape: f32[8,128], index: 7, kind: input, shape index: {}]   ;;  %s2329_s8 = inlined_call_operand.vmem [shape: f32[8,128], index: 8, kind: output, shape index: {}]  }
   0x1   :  { %14 = vsyncpa [#allocation5], 0 }
   0x2   :  { %15 = vsyncpa [#allocation8], 0  ;;  %s1916_s27 = smov [#allocation4]   ;;  %s1800_s9 = scalar_lea.hbm %s2324_s3, 10240 }
   0x3   :  { %s37_s28 = sshll.u32 %s1916_s27, 4  ;;  %p1801_p0 = scmp.ne.s32.totalorder %s2324_s3, %s1800_s9  ;;  %s38_s28 = int_to_ptr.vmem [resolvable:$true] %s37_s28 }
   0x4   :  { %p1804_p1 = scmp.lt.u32.totalorder %s1800_s9, %s2324_s3 }
   0x6   :  { %p1806_p2 = pnand %p1804_p1, %p1801_p0 }
   0x8   :  { %1809 = shalt.err (!%p1806_p2)
}
   0x9   :  { %s1810_s14 = scalar_lea.vmem %s38_s28, 10240  ;;  %p1815_p4 = scmp.lt.s32.totalorder %s38_s28, %s38_s28 }
   0xa   :  { %p1811_p3 = scmp.ne.s32.totalorder %s38_s28, %s1810_s14  ;;  %p1816_p5 = scmp.lt.s32.totalorder %s1810_s14, %s1810_s14 }
   0xc   :  { %p1817_p6 = por %p1816_p5, %p1815_p4 }
   0xe   :  { %p1818_p7 = pnand %p1817_p6, %p1811_p3 }
  0x10   :  { %1821 = shalt.err (!%p1818_p7)
}
  0x11   :  { %s1917_s15 = smov 640   ;;  %s1918_s16 = smov 40  }
  0x12   :  { %43 = dma.hbm_to_vmem [thread:$0]  %s2324_s3, 10240, %s38_s28, [#allocation5], %s1917_s15, %s1917_s15, %s1918_s16  }
  0x13   :  { %s1919_s19 = smov [#allocation7]   ;;  %s1920_s21 = smov [#allocation2]  }
  0x14   :  { %s61_s20 = sshll.u32 %s1919_s19, 4  ;;  %s25_s22 = sshll.u32 %s1920_s21, 4  ;;  %s62_s20 = int_to_ptr.vmem [resolvable:$true] %s61_s20  ;;  %s26_s22 = int_to_ptr.vmem [resolvable:$true] %s25_s22 }
  0x15   :  { %s1822_s25 = scalar_lea.hbm %s2327_s6, 2048 }
  0x16   :  { %p1823_p8 = scmp.ne.s32.totalorder %s2327_s6, %s1822_s25  ;;  %p1826_p9 = scmp.lt.u32.totalorder %s1822_s25, %s2327_s6 }
  0x18   :  { %p1828_p10 = pnand %p1826_p9, %p1823_p8 }
  0x1a   :  { %1831 = shalt.err (!%p1828_p10)
}
  0x1b   :  { %s1832_s3 = scalar_lea.vmem %s62_s20, 2048  ;;  %p1837_p12 = scmp.lt.s32.totalorder %s62_s20, %s62_s20 }
  0x1c   :  { %p1833_p11 = scmp.ne.s32.totalorder %s62_s20, %s1832_s3  ;;  %p1838_p13 = scmp.lt.s32.totalorder %s1832_s3, %s1832_s3 }
  0x1e   :  { %p1839_p0 = por %p1838_p13, %p1837_p12 }
  0x20   :  { %p1840_p1 = pnand %p1839_p0, %p1833_p11 }
  0x22   :  { %1843 = shalt.err (!%p1840_p1)
}
  0x23   :  { %s1921_s28 = smov 128   ;;  %s1922_s9 = smov 8  }
  0x24   :  { %67 = dma.hbm_to_vmem [thread:$0]  %s2327_s6, 2048, %s62_s20, [#allocation8], %s1921_s28, %s1921_s28, %s1922_s9  }
  0x25   :  { %s1844_s14 = scalar_lea.hbm %s2323_s2, 768 }
  0x26   :  { %p1845_p2 = scmp.ne.s32.totalorder %s2323_s2, %s1844_s14  ;;  %p1848_p3 = scmp.lt.u32.totalorder %s1844_s14, %s2323_s2 }
  0x28   :  { %p1850_p4 = pnand %p1848_p3, %p1845_p2 }
  0x2a   :  { %1853 = shalt.err (!%p1850_p4)
}
  0x2b   :  { %s1854_s19 = scalar_lea.vmem %s26_s22, 768  ;;  %p1859_p6 = scmp.lt.s32.totalorder %s26_s22, %s26_s22 }
  0x2c   :  { %p1855_p5 = scmp.ne.s32.totalorder %s26_s22, %s1854_s19  ;;  %p1860_p7 = scmp.lt.s32.totalorder %s1854_s19, %s1854_s19 }
  0x2e   :  { %p1861_p8 = por %p1860_p7, %p1859_p6 }
  0x30   :  { %p1862_p9 = pnand %p1861_p8, %p1855_p5 }
  0x32   :  { %1865 = shalt.err (!%p1862_p9)
}
  0x33   :  { %31 = dma.hbm_to_vmem [thread:$0]  %s2323_s2, 768, %s26_s22, [#allocation3], %s1921_s28, %s1921_s28, %s1922_s9  }
  0x34   :  { %s1923_s21 = smov [#allocation6]   ;;  %s1924_s24 = smov [#allocation9]  }
  0x35   :  { %s50_s23 = sshll.u32 %s1923_s21, 4  ;;  %s74_s25 = sshll.u32 %s1924_s24, 4  ;;  %s51_s23 = int_to_ptr.vmem [resolvable:$true] %s50_s23  ;;  %s75_s25 = int_to_ptr.vmem [resolvable:$true] %s74_s25 }
  0x36   :  { %s1866_s29 = scalar_lea.hbm %s2325_s4, 640 }
  0x37   :  { %p1867_p10 = scmp.ne.s32.totalorder %s2325_s4, %s1866_s29  ;;  %p1870_p11 = scmp.lt.u32.totalorder %s1866_s29, %s2325_s4 }
  0x39   :  { %p1872_p12 = pnand %p1870_p11, %p1867_p10 }
  0x3b   :  { %1875 = shalt.err (!%p1872_p12)
}
  0x3c   :  { %s1876_s2 = scalar_lea.vmem %s51_s23, 640  ;;  %p1881_p0 = scmp.lt.s32.totalorder %s51_s23, %s51_s23 }
  0x3d   :  { %p1877_p13 = scmp.ne.s32.totalorder %s51_s23, %s1876_s2  ;;  %p1882_p1 = scmp.lt.s32.totalorder %s1876_s2, %s1876_s2 }
  0x3f   :  { %p1883_p2 = por %p1882_p1, %p1881_p0 }
  0x41   :  { %p1884_p3 = pnand %p1883_p2, %p1877_p13 }
  0x43   :  { %1887 = shalt.err (!%p1884_p3)
}
  0x44   :  { %53 = dma.hbm_to_vmem [thread:$0]  %s2325_s4, 640, %s51_s23, [#allocation5]  }
  0x45   :  { %s1888_s13 = scalar_lea.hbm %s2328_s7, 128 }
  0x46   :  { %p1889_p4 = scmp.ne.s32.totalorder %s2328_s7, %s1888_s13  ;;  %p1892_p5 = scmp.lt.u32.totalorder %s1888_s13, %s2328_s7 }
  0x48   :  { %p1894_p6 = pnand %p1892_p5, %p1889_p4 }
  0x4a   :  { %1897 = shalt.err (!%p1894_p6)
}
  0x4b   :  { %s1898_s18 = scalar_lea.vmem %s75_s25, 128  ;;  %p1903_p8 = scmp.lt.s32.totalorder %s75_s25, %s75_s25 }
  0x4c   :  { %p1899_p7 = scmp.ne.s32.totalorder %s75_s25, %s1898_s18  ;;  %p1904_p9 = scmp.lt.s32.totalorder %s1898_s18, %s1898_s18 }
  0x4e   :  { %p1905_p10 = por %p1904_p9, %p1903_p8 }
  0x50   :  { %p1906_p11 = pnand %p1905_p10, %p1899_p7 }
  0x52   :  { %1909 = shalt.err (!%p1906_p11)
}
  0x53   :  { %77 = dma.hbm_to_vmem [thread:$0]  %s2328_s7, 128, %s75_s25, [#allocation8]  }
  0x54   :  { %1910 = dma.done.wait [#allocation3], 768  }
  0x55   :  { %1911 = vsyncadd [#allocation3], 4294966528 }
  0x56   :  { %1912 = dma.done.wait [#allocation5], 10880  }
  0x57   :  { %1913 = vsyncadd [#allocation5], 4294956416 }
  0x58   :  { %1914 = dma.done.wait [#allocation8], 2176  }
  0x59   :  { %1915 = vsyncadd [#allocation8], 4294965120  ;;  %v1925_v0 = vmov 0.0|0.0   ;;  %vm1926_vm0 = vmmov 0   ;;  %v1927_v1 = vmov 0.0   ;;  %v94_v2 = vld [vmem:[%s2322_s1] sm:$0xff] }
  0x5a   :  { %1486 = vmatprep.subr.bf16.mxu0 %v1925_v0  ;;  %1238 = vmatprep.mubr.msk.f32.mxu0 %vm1926_vm0, %v1927_v1  ;;  %v95_v3 = vld [vmem:[%s2322_s1 + $0x8] sm:$0xff]  ;;  %v96_v4 = vld [vmem:[%s2322_s1 + $0x10] sm:$0xff]  ;;  %v97_v6 = vld [vmem:[%s2322_s1 + $0x18] sm:$0xff]  ;;  %s1930_s30 = smov 96  }
  0x5b   :  { %352 = vmatprep.mubr.f32.mxu1 %v1927_v1  ;;  %v1487_v5 = vpack.c.bf16 %v95_v3, %v94_v2  ;;  %v1490_v7 = vpack.c.bf16 %v97_v6, %v96_v4  ;;  %v98_v8 = vld [vmem:[%s2322_s1 + $0x20] sm:$0xff]  ;;  %v99_v9 = vld [vmem:[%s2322_s1 + $0x28] sm:$0xff]  ;;  %v100_v11 = vld [vmem:[%s2322_s1 + $0x30] sm:$0xff] }
  0x5c   :  { %v1493_v10 = vpack.c.bf16 %v99_v9, %v98_v8  ;;  %v101_v12 = vld [vmem:[%s2322_s1 + $0x38] sm:$0xff]  ;;  %v102_v14 = vld [vmem:[%s2322_s1 + $0x40] sm:$0xff]  ;;  %v103_v15 = vld [vmem:[%s2322_s1 + $0x48] sm:$0xff] }
  0x5d   :  { %1488 = vmatpush3.bf16.msra.mxu0 %v1487_v5  ;;  %v1496_v13 = vpack.c.bf16 %v101_v12, %v100_v11  ;;  %v1499_v16 = vpack.c.bf16 %v103_v15, %v102_v14  ;;  %v104_v17 = vld [vmem:[%s2322_s1 + $0x50] sm:$0xff]  ;;  %v105_v18 = vld [vmem:[%s2322_s1 + $0x58] sm:$0xff]  ;;  %v106_v20 = vld [vmem:[%s2322_s1 + $0x60] sm:$0xff] }
  0x5e   :  { %1489 = vmatprep.subr.bf16.mxu0 %v1925_v0  ;;  %v1502_v19 = vpack.c.bf16 %v105_v18, %v104_v17  ;;  %v107_v21 = vld [vmem:[%s2322_s1 + $0x68] sm:$0xff]  ;;  %v108_v23 = vld [vmem:[%s2322_s1 + $0x70] sm:$0xff]  ;;  %v109_v24 = vld [vmem:[%s2322_s1 + $0x78] sm:$0xff] }
  0x5f   :  { %v1505_v22 = vpack.c.bf16 %v107_v21, %v106_v20  ;;  %v1508_v25 = vpack.c.bf16 %v109_v24, %v108_v23  ;;  %v93_v26 = vld [vmem:[%s2321_s0] sm:$0xff]  ;;  %v204_v27 = vld [vmem:[#allocation4 + $0x8] sm:$0xff]  ;;  %v206_v29 = vld [vmem:[#allocation4 + $0x18] sm:$0xff]  ;;  %s1928_s0 = smov 64  }
  0x60   :  { %v209_v28 = vld [vmem:[#allocation4 + $0x30] sm:$0xff]  ;;  %v211_v31 = vld [vmem:[#allocation4 + $0x40] sm:$0xff]  ;;  %v208_v33 = vld [vmem:[#allocation4 + $0x28] sm:$0xff] }
  0x61   :  { %1491 = vmatpush3.bf16.msra.mxu0 %v1490_v7  ;;  %v1510_v30 = vpack.c.bf16 %v209_v28, %v204_v27  ;;  %v203_v32 = vld [vmem:[#allocation4] sm:$0xff]  ;;  %v1542_v34 = vpack.c.bf16 %v211_v31, %v206_v29  ;;  %v205_v36 = vld [vmem:[#allocation4 + $0x10] sm:$0xff]  ;;  %v210_v37 = vld [vmem:[#allocation4 + $0x38] sm:$0xff] }
  0x62   :  { %1492 = vmatprep.subr.bf16.mxu0 %v1925_v0  ;;  %v1512_v35 = vpack.c.bf16 %v208_v33, %v203_v32  ;;  %v214_v38 = vld [vmem:[#allocation4 + $0x58] sm:$0xff]  ;;  %v1544_v39 = vpack.c.bf16 %v210_v37, %v205_v36  ;;  %v219_v40 = vld [vmem:[#allocation4 + $0x80] sm:$0xff]  ;;  %v216_v41 = vld [vmem:[#allocation4 + $0x68] sm:$0xff] }
  0x63   :  { %1511 = vmatprep.subr.bf16.mxu1 %v1510_v30  ;;  %v221_v42 = vld [vmem:[#allocation4 + $0x90] sm:$0xff]  ;;  %v1514_v43 = vpack.c.bf16 %v219_v40, %v214_v38  ;;  %v218_v46 = vld [vmem:[#allocation4 + $0x78] sm:$0xff]  ;;  %v215_v47 = vld [vmem:[#allocation4 + $0x60] sm:$0xff] }
  0x64   :  { %1513 = vmatpush1.bf16.msra.mxu1 %v1512_v35  ;;  %v1546_v44 = vpack.c.bf16 %v221_v42, %v216_v41  ;;  %v213_v45 = vld [vmem:[#allocation4 + $0x50] sm:$0xff]  ;;  %v220_v49 = vld [vmem:[#allocation4 + $0x88] sm:$0xff]  ;;  %v226_v54 = vld [vmem:[#allocation4 + $0xb8] sm:$0xff] }
  0x65   :  { %1494 = vmatpush3.bf16.msra.mxu0 %v1493_v10  ;;  %v1516_v48 = vpack.c.bf16 %v218_v46, %v213_v45  ;;  %v224_v50 = vld [vmem:[#allocation4 + $0xa8] sm:$0xff]  ;;  %v229_v51 = vld [vmem:[#allocation4 + $0xd0] sm:$0xff]  ;;  %1515 = vmatprep.subr.bf16.mxu1 %v1514_v43  ;;  %v1548_v52 = vpack.c.bf16 %v220_v49, %v215_v47  ;;  %v231_v55 = vld [vmem:[#allocation4 + $0xe0] sm:$0xff] }
  0x66   :  { %1495 = vmatprep.subr.bf16.mxu0 %v1925_v0  ;;  %v1518_v53 = vpack.c.bf16 %v229_v51, %v224_v50  ;;  %v223_v56 = vld [vmem:[#allocation4 + $0xa0] sm:$0xff]  ;;  %v1550_v57 = vpack.c.bf16 %v231_v55, %v226_v54  ;;  %v228_v58 = vld [vmem:[#allocation4 + $0xc8] sm:$0xff]  ;;  %v225_v59 = vld [vmem:[#allocation4 + $0xb0] sm:$0xff] }
  0x67   :  { %v230_v60 = vld [vmem:[#allocation4 + $0xd8] sm:$0xff]  ;;  %v1520_v61 = vpack.c.bf16 %v228_v58, %v223_v56  ;;  %v239_v63 = vld [vmem:[#allocation4 + $0x120] sm:$0xff]  ;;  %v236_v2 = vld [vmem:[#allocation4 + $0x108] sm:$0xff] }
  0x68   :  { %1517 = vmatpush1.bf16.msra.mxu1 %v1516_v48  ;;  %v234_v62 = vld [vmem:[#allocation4 + $0xf8] sm:$0xff]  ;;  %v1552_v3 = vpack.c.bf16 %v230_v60, %v225_v59  ;;  %v241_v5 = vld [vmem:[#allocation4 + $0x130] sm:$0xff]  ;;  %v235_v9 = vld [vmem:[#allocation4 + $0x100] sm:$0xff] }
  0x69   :  { %1497 = vmatpush3.bf16.msra.mxu0 %v1496_v13  ;;  %1519 = vmatprep.subr.bf16.mxu1 %v1518_v53  ;;  %v1522_v4 = vpack.c.bf16 %v239_v63, %v234_v62  ;;  %v233_v6 = vld [vmem:[#allocation4 + $0xf0] sm:$0xff]  ;;  %v238_v7 = vld [vmem:[#allocation4 + $0x118] sm:$0xff]  ;;  %v1554_v8 = vpack.c.bf16 %v241_v5, %v236_v2  ;;  %v240_v10 = vld [vmem:[#allocation4 + $0x128] sm:$0xff] }
  0x6a   :  { %1498 = vmatprep.subr.bf16.mxu0 %v1925_v0  ;;  %v244_v11 = vld [vmem:[#allocation4 + $0x148] sm:$0xff]  ;;  %v249_v12 = vld [vmem:[#allocation4 + $0x170] sm:$0xff]  ;;  %v246_v13 = vld [vmem:[#allocation4 + $0x158] sm:$0xff]  ;;  %v1524_v15 = vpack.c.bf16 %v238_v7, %v233_v6 }
  0x6b   :  { %v251_v14 = vld [vmem:[#allocation4 + $0x180] sm:$0xff]  ;;  %v1526_v17 = vpack.c.bf16 %v249_v12, %v244_v11  ;;  %v245_v21 = vld [vmem:[#allocation4 + $0x150] sm:$0xff]  ;;  %v256_v27 = vld [vmem:[#allocation4 + $0x1a8] sm:$0xff] }
  0x6c   :  { %1521 = vmatpush1.bf16.msra.mxu1 %v1520_v61  ;;  %v243_v18 = vld [vmem:[#allocation4 + $0x140] sm:$0xff]  ;;  %v1558_v20 = vpack.c.bf16 %v251_v14, %v246_v13  ;;  %v261_v29 = vld [vmem:[#allocation4 + $0x1d0] sm:$0xff]  ;;  %v258_v31 = vld [vmem:[#allocation4 + $0x1b8] sm:$0xff] }
  0x6d   :  { %1500 = vmatpush3.bf16.msra.mxu0 %v1499_v16  ;;  %1523 = vmatprep.subr.bf16.mxu1 %v1522_v4  ;;  %v1556_v16 = vpack.c.bf16 %v240_v10, %v235_v9  ;;  %v253_v30 = vld [vmem:[#allocation4 + $0x190] sm:$0xff]  ;;  %v1562_v32 = vpack.c.bf16 %v261_v29, %v256_v27  ;;  %v260_v35 = vld [vmem:[#allocation4 + $0x1c8] sm:$0xff]  ;;  %v271_v41 = vld [vmem:[#allocation4 + $0x220] sm:$0xff] }
  0x6e   :  { %1501 = vmatprep.subr.bf16.mxu0 %v1925_v0  ;;  %v1532_v33 = vpack.c.bf16 %v258_v31, %v253_v30  ;;  %v264_v37 = vld [vmem:[#allocation4 + $0x1e8] sm:$0xff]  ;;  %v269_v38 = vld [vmem:[#allocation4 + $0x210] sm:$0xff]  ;;  %v263_v42 = vld [vmem:[#allocation4 + $0x1e0] sm:$0xff] }
  0x6f   :  { %v1534_v40 = vpack.c.bf16 %v269_v38, %v264_v37  ;;  %v268_v43 = vld [vmem:[#allocation4 + $0x208] sm:$0xff]  ;;  %v265_v46 = vld [vmem:[#allocation4 + $0x1f0] sm:$0xff]  ;;  %v270_v47 = vld [vmem:[#allocation4 + $0x218] sm:$0xff] }
  0x70   :  { %1525 = vmatpush1.bf16.msra.mxu1 %v1524_v15  ;;  %v1536_v45 = vpack.c.bf16 %v268_v43, %v263_v42  ;;  %v1568_v48 = vpack.c.bf16 %v270_v47, %v265_v46  ;;  %v274_v49 = vld [vmem:[#allocation4 + $0x238] sm:$0xff]  ;;  %v279_v50 = vld [vmem:[#allocation4 + $0x260] sm:$0xff]  ;;  %v276_v51 = vld [vmem:[#allocation4 + $0x248] sm:$0xff] }
  0x71   :  { %1503 = vmatpush3.bf16.msra.mxu0 %v1502_v19  ;;  %v248_v19 = vld [vmem:[#allocation4 + $0x168] sm:$0xff]  ;;  %1527 = vmatprep.subr.bf16.mxu1 %v1526_v17  ;;  %v281_v53 = vld [vmem:[#allocation4 + $0x270] sm:$0xff]  ;;  %v278_v55 = vld [vmem:[#allocation4 + $0x258] sm:$0xff] }
  0x72   :  { %1504 = vmatprep.subr.bf16.mxu0 %v1925_v0  ;;  %v1528_v23 = vpack.c.bf16 %v248_v19, %v243_v18  ;;  %v273_v54 = vld [vmem:[#allocation4 + $0x230] sm:$0xff]  ;;  %v1570_v56 = vpack.c.bf16 %v281_v53, %v276_v51  ;;  %v275_v58 = vld [vmem:[#allocation4 + $0x240] sm:$0xff]  ;;  %v280_v59 = vld [vmem:[#allocation4 + $0x268] sm:$0xff] }
  0x73   :  { %v1572_v60 = vpack.c.bf16 %v280_v59, %v275_v58  ;;  %v182_v63 = vld [vmem:[#allocation2] sm:$0xff]  ;;  %v184_v4 = vld [vmem:[#allocation2 + $0x8] sm:$0xff]  ;;  %v188_v5 = vld [vmem:[#allocation2 + $0x18] sm:$0xff] }
  0x74   :  { %1529 = vmatpush1.bf16.msra.mxu1 %v1528_v23  ;;  %v186_v9 = vld [vmem:[#allocation2 + $0x10] sm:$0xff]  ;;  %v190_v13 = vld [vmem:[#allocation2 + $0x20] sm:$0xff]  ;;  %v504_v18 = vld [vmem:[%s2326_s5 + $0x8] sm:$0xff] }
  0x75   :  { %1506 = vmatpush3.bf16.msra.mxu0 %v1505_v22  ;;  %v250_v22 = vld [vmem:[#allocation4 + $0x178] sm:$0xff]  ;;  %v207_v14 = vld [vmem:[#allocation4 + $0x20] sm:$0xff]  ;;  %v503_v17 = vld [vmem:[%s2326_s5] sm:$0xff] }
  0x76   :  { %1507 = vmatprep.subr.bf16.mxu0 %v1925_v0  ;;  %v1560_v24 = vpack.c.bf16 %v250_v22, %v245_v21  ;;  %v192_v19 = vld [vmem:[#allocation2 + $0x28] sm:$0xff]  ;;  %v2108_v22 = vpack.c.bf16 %v504_v18, %v503_v17  ;;  %v217_v23 = vld [vmem:[#allocation4 + $0x70] sm:$0xff]  ;;  %v506_v27 = vld [vmem:[%s2326_s5 + $0x18] sm:$0xff] }
  0x77   :  { %v227_v30 = vld [vmem:[#allocation4 + $0xc0] sm:$0xff]  ;;  %v232_v31 = vld [vmem:[#allocation4 + $0xe8] sm:$0xff]  ;;  %v242_v37 = vld [vmem:[#allocation4 + $0x138] sm:$0xff] }
  0x78   :  { %v509_v38 = vld [vmem:[%s2326_s5 + $0x30] sm:$0xff]  ;;  %v252_v43 = vld [vmem:[#allocation4 + $0x188] sm:$0xff] }
  0x79   :  { %1509 = vmatpush3.bf16.msra.mxu0 %v1508_v25  ;;  %v254_v25 = vld [vmem:[#allocation4 + $0x198] sm:$0xff]  ;;  %v247_v42 = vld [vmem:[#allocation4 + $0x160] sm:$0xff]  ;;  %v514_v51 = vld [vmem:[%s2326_s5 + $0x58] sm:$0xff] }
  0x7a   :  { %1543 = vmatprep.subr.bf16.mxu0 %v1542_v34  ;;  %v255_v34 = vld [vmem:[#allocation4 + $0x1a0] sm:$0xff]  ;;  %v1587_v46 = vpack.c.bf16 %v252_v43, %v247_v42 }
  0x7b   :  { %v1564_v36 = vpack.c.bf16 %v260_v35, %v255_v34  ;;  %v1581_v34 = vpack.c.bf16 %v232_v31, %v227_v30  ;;  %v284_v31 = vld [vmem:[#allocation6 + $0x8] sm:$0xff] }
  0x7c   :  { %1239 = vmatmul.mubr.f32.vlgmr.msra.gmra.mrb[0].mxu0 %v93_v26  ;;  %v259_v26 = vld [vmem:[#allocation4 + $0x1c0] sm:$0xff] }
  0x7d   :  { %423 = vmatprep.mubr.f32.mxu0 %v1927_v1  ;;  %1545 = vmatpush1.bf16.msra.mxu0 %v1544_v39  ;;  %v1530_v28 = vpack.c.bf16 %v259_v26, %v254_v25  ;;  %v266_v39 = vld [vmem:[#allocation4 + $0x1f8] sm:$0xff]  ;;  %v505_v26 = vld [vmem:[%s2326_s5 + $0x10] sm:$0xff] }
  0x7e   :  { %1547 = vmatprep.subr.bf16.mxu0 %v1546_v44  ;;  %v1566_v44 = vpack.c.bf16 %v271_v41, %v266_v39  ;;  %v222_v25 = vld [vmem:[#allocation4 + $0x98] sm:$0xff]  ;;  %v2121_v29 = vpack.c.bf16 %v506_v27, %v505_v26  ;;  %v510_v39 = vld [vmem:[%s2326_s5 + $0x38] sm:$0xff] }
  0x7f   :  { %1531 = vmatprep.subr.bf16.mxu1 %v1530_v28  ;;  %v1578_v28 = vpack.c.bf16 %v222_v25, %v217_v23  ;;  %v2147_v41 = vpack.c.bf16 %v510_v39, %v509_v38 }
  0x80   :  { %1533 = vmatpush1.bf16.msra.mxu1 %v1532_v33  ;;  %v508_v33 = vld [vmem:[%s2326_s5 + $0x28] sm:$0xff] }
  0x81   :  { %1549 = vmatpush1.bf16.msra.mxu0 %v1548_v52  ;;  %1535 = vmatprep.subr.bf16.mxu1 %v1534_v40  ;;  %v1538_v52 = vpack.c.bf16 %v279_v50, %v274_v49  ;;  %v262_v49 = vld [vmem:[#allocation4 + $0x1d8] sm:$0xff]  ;;  %v513_v50 = vld [vmem:[%s2326_s5 + $0x50] sm:$0xff] }
  0x82   :  { %1551 = vmatprep.subr.bf16.mxu0 %v1550_v57  ;;  %v1540_v57 = vpack.c.bf16 %v278_v55, %v273_v54  ;;  %v2169_v53 = vpack.c.bf16 %v514_v51, %v513_v50  ;;  %v267_v54 = vld [vmem:[#allocation4 + $0x200] sm:$0xff]  ;;  %v272_v55 = vld [vmem:[#allocation4 + $0x228] sm:$0xff] }
  0x83   :  { %v1593_v58 = vpack.c.bf16 %v272_v55, %v267_v54  ;;  %v285_v54 = vld [vmem:[#allocation6 + $0x10] sm:$0xff] }
  0x84   :  { %1537 = vmatpush1.bf16.msra.mxu1 %v1536_v45  ;;  %v512_v45 = vld [vmem:[%s2326_s5 + $0x48] sm:$0xff] }
  0x85   :  { %1553 = vmatpush1.bf16.msra.mxu0 %v1552_v3  ;;  %1539 = vmatprep.subr.bf16.mxu1 %v1538_v52 }
  0x86   :  { %1555 = vmatprep.subr.bf16.mxu0 %v1554_v8 }
  0x88   :  { %1541 = vmatpush1.bf16.msra.mxu1 %v1540_v57  ;;  %v516_v57 = vld [vmem:[%s2326_s5 + $0x68] sm:$0xff] }
  0x89   :  { %1557 = vmatpush1.bf16.msra.mxu0 %v1556_v16  ;;  %1574 = vmatprep.subr.bf16.mxu1 %v1925_v0  ;;  %v212_v16 = vld [vmem:[#allocation4 + $0x48] sm:$0xff] }
  0x8a   :  { %1559 = vmatprep.subr.bf16.mxu0 %v1558_v20  ;;  %v1575_v21 = vpack.c.bf16 %v212_v16, %v207_v14  ;;  %v500_v16 = vlaneseq }
  0x8c   :  { %v2240_v17 = vand.u32 127, %v500_v16 }
  0x8d   :  { %1561 = vmatpush1.bf16.msra.mxu0 %v1560_v24 }
  0x8e   :  { %1563 = vmatprep.subr.bf16.mxu0 %v1562_v32  ;;  %v507_v32 = vld [vmem:[%s2326_s5 + $0x20] sm:$0xff]  ;;  %vm502_vm1 = vcmp.ge.s32.totalorder %v2240_v17, 96 }
  0x8f   :  { %v2136_v35 = vpack.c.bf16 %v508_v33, %v507_v32 }
  0x91   :  { %1565 = vmatpush1.bf16.msra.mxu0 %v1564_v36  ;;  %v237_v36 = vld [vmem:[#allocation4 + $0x110] sm:$0xff] }
  0x92   :  { %1567 = vmatprep.subr.bf16.mxu0 %v1566_v44  ;;  %v1584_v40 = vpack.c.bf16 %v242_v37, %v237_v36  ;;  %v511_v44 = vld [vmem:[%s2326_s5 + $0x40] sm:$0xff] }
  0x93   :  { %v2158_v47 = vpack.c.bf16 %v512_v45, %v511_v44 }
  0x95   :  { %1569 = vmatpush1.bf16.msra.mxu0 %v1568_v48  ;;  %v257_v48 = vld [vmem:[#allocation4 + $0x1b0] sm:$0xff] }
  0x96   :  { %1571 = vmatprep.subr.bf16.mxu0 %v1570_v56  ;;  %v1590_v52 = vpack.c.bf16 %v262_v49, %v257_v48  ;;  %v515_v56 = vld [vmem:[%s2326_s5 + $0x60] sm:$0xff] }
  0x97   :  { %v2180_v59 = vpack.c.bf16 %v516_v57, %v515_v56 }
  0x99   :  { %1573 = vmatpush1.bf16.msra.mxu0 %v1572_v60  ;;  %v277_v60 = vld [vmem:[#allocation4 + $0x250] sm:$0xff] }
  0x9a   :  { %1598 = vmatprep.subr.bf16.mxu0 %v1925_v0 }
 0x14f   :  { %v176_v61 = vpop.f32.mrb[0].mxu0 }
 0x150   :  { %180 = vrot.lane.b32.xlu0 %v176_v61, %s1928_s0  ;;  %v1240_v62 = vpop.f32.mrb[1].mxu0  ;;  %v193_v2 = vadd.f32 %v182_v63, %v176_v61  ;;  %v282_v61 = vld [vmem:[#allocation4 + $0x278] sm:$0xff]  ;;  %v518_v63 = vld [vmem:[%s2326_s5 + $0x78] sm:$0xff] }
 0x151   :  { %v517_v62 = vld [vmem:[%s2326_s5 + $0x70] sm:$0xff]  ;;  %s1929_s5 = smov 32  }
 0x152   :  { %v194_v3 = vmax.f32 %v193_v2, 0.0  ;;  %v1596_v2 = vpack.c.bf16 %v282_v61, %v277_v60 }
 0x154   :  { %v196_v7 = vmul.f32 %v194_v3, %v184_v4  ;;  %v2191_v3 = vpack.c.bf16 %v518_v63, %v517_v62 }
 0x1c2   :  { %v181_v6 = vpop.permute.xlu0 %180 }
 0x1c3   :  { %v195_v8 = vadd.f32 %v188_v5, %v181_v6 }
 0x1c5   :  { %v197_v10 = vadd.f32 %v196_v7, %v195_v8  ;;  %v283_v8 = vld [vmem:[#allocation6] sm:$0xff] }
 0x1c7   :  { %v198_v11 = vadd.f32 %v197_v10, %v186_v9 }
 0x1c9   :  { %v199_v12 = vmax.f32 %v198_v11, 0.0 }
 0x1cb   :  { %v200_v15 = vsub.f32 %v199_v12, %v199_v12 }
 0x1cd   :  { %v201_v20 = vmul.f32 %v200_v15, %v190_v13 }
 0x1cf   :  { %v2110_v24 = vadd.f32 %v201_v20, %v192_v19 }
 0x1d1   :  { %353 = vmatmul.mubr.f32.vlgmr.msra.gmra.mrb[0].mxu1 %v2110_v24  ;;  %424 = vmatmul.mubr.f32.vlgmr.msra.gmra.mrb[2].mxu0 %v2110_v24 }
 0x1d2   :  { %1576 = vmatpush3.bf16.msra.mxu1 %v1575_v21  ;;  %1600 = vmatpush3.bf16.msra.mxu0 %v2108_v22 }
 0x1d3   :  { %1577 = vmatprep.subr.bf16.mxu1 %v1925_v0  ;;  %1601 = vmatprep.subr.bf16.mxu0 %v1925_v0 }
 0x1d4   :  { %1273 = vmatprep.mubr.msk.f32.mxu1 %vm1926_vm0, %v1927_v1  ;;  %1308 = vmatprep.mubr.msk.f32.mxu0 %vm1926_vm0, %v1927_v1 }
 0x1d6   :  { %1579 = vmatpush3.bf16.msra.mxu1 %v1578_v28  ;;  %1603 = vmatpush3.bf16.msra.mxu0 %v2121_v29 }
 0x1d7   :  { %1580 = vmatprep.subr.bf16.mxu1 %v1925_v0  ;;  %1604 = vmatprep.subr.bf16.mxu0 %v1925_v0 }
 0x1da   :  { %1582 = vmatpush3.bf16.msra.mxu1 %v1581_v34  ;;  %1606 = vmatpush3.bf16.msra.mxu0 %v2136_v35 }
 0x1db   :  { %1583 = vmatprep.subr.bf16.mxu1 %v1925_v0  ;;  %1607 = vmatprep.subr.bf16.mxu0 %v1925_v0 }
 0x1de   :  { %1585 = vmatpush3.bf16.msra.mxu1 %v1584_v40  ;;  %1609 = vmatpush3.bf16.msra.mxu0 %v2147_v41 }
 0x1df   :  { %1586 = vmatprep.subr.bf16.mxu1 %v1925_v0  ;;  %1610 = vmatprep.subr.bf16.mxu0 %v1925_v0 }
 0x1e2   :  { %1588 = vmatpush3.bf16.msra.mxu1 %v1587_v46  ;;  %1612 = vmatpush3.bf16.msra.mxu0 %v2158_v47 }
 0x1e3   :  { %1589 = vmatprep.subr.bf16.mxu1 %v1925_v0  ;;  %1613 = vmatprep.subr.bf16.mxu0 %v1925_v0 }
 0x1e6   :  { %1591 = vmatpush3.bf16.msra.mxu1 %v1590_v52  ;;  %1615 = vmatpush3.bf16.msra.mxu0 %v2169_v53 }
 0x1e7   :  { %1592 = vmatprep.subr.bf16.mxu1 %v1925_v0  ;;  %1616 = vmatprep.subr.bf16.mxu0 %v1925_v0 }
 0x1ea   :  { %1594 = vmatpush3.bf16.msra.mxu1 %v1593_v58  ;;  %1618 = vmatpush3.bf16.msra.mxu0 %v2180_v59 }
 0x1eb   :  { %1595 = vmatprep.subr.bf16.mxu1 %v1925_v0  ;;  %1619 = vmatprep.subr.bf16.mxu0 %v1925_v0 }
 0x1ee   :  { %1597 = vmatpush3.bf16.msra.mxu1 %v1596_v2  ;;  %1621 = vmatpush3.bf16.msra.mxu0 %v2191_v3 }
 0x1ef   :  { %1622 = vmatprep.subr.bf16.mxu1 %v1925_v0  ;;  %1646 = vmatprep.subr.bf16.mxu0 %v1925_v0 }
 0x1f1   :  { %1274 = vmatmul.mubr.f32.vlgmr.msra.gmra.mrb[2].mxu1 %v2110_v24  ;;  %1309 = vmatmul.mubr.f32.vlgmr.msra.gmra.mrb[4].mxu0 %v1927_v1 }
 0x1f2   :  { %1624 = vmatpush3.bf16.msra.mxu1 %v2108_v22  ;;  %1343 = vmatprep.mubr.msk.f32.mxu1 %vm1926_vm0, %v1927_v1 }
 0x1f3   :  { %1625 = vmatprep.subr.bf16.mxu1 %v1925_v0  ;;  %1648 = vmatpush3.bf16.msra.mxu0 %v2108_v22 }
 0x1f4   :  { %1649 = vmatprep.subr.bf16.mxu0 %v1925_v0  ;;  %1378 = vmatprep.mubr.msk.f32.mxu0 %vm1926_vm0, %v1927_v1 }
 0x1f6   :  { %1627 = vmatpush3.bf16.msra.mxu1 %v2121_v29 }
 0x1f7   :  { %1628 = vmatprep.subr.bf16.mxu1 %v1925_v0  ;;  %1651 = vmatpush3.bf16.msra.mxu0 %v2121_v29 }
 0x1f8   :  { %1652 = vmatprep.subr.bf16.mxu0 %v1925_v0 }
 0x1fa   :  { %1630 = vmatpush3.bf16.msra.mxu1 %v2136_v35 }
 0x1fb   :  { %1631 = vmatprep.subr.bf16.mxu1 %v1925_v0  ;;  %1654 = vmatpush3.bf16.msra.mxu0 %v2136_v35 }
 0x1fc   :  { %1655 = vmatprep.subr.bf16.mxu0 %v1925_v0 }
 0x1fe   :  { %1633 = vmatpush3.bf16.msra.mxu1 %v2147_v41 }
 0x1ff   :  { %1634 = vmatprep.subr.bf16.mxu1 %v1925_v0  ;;  %1657 = vmatpush3.bf16.msra.mxu0 %v2147_v41 }
 0x200   :  { %1658 = vmatprep.subr.bf16.mxu0 %v1925_v0 }
 0x202   :  { %1636 = vmatpush3.bf16.msra.mxu1 %v2158_v47 }
 0x203   :  { %1637 = vmatprep.subr.bf16.mxu1 %v1925_v0  ;;  %1660 = vmatpush3.bf16.msra.mxu0 %v2158_v47 }
 0x204   :  { %1661 = vmatprep.subr.bf16.mxu0 %v1925_v0 }
 0x206   :  { %1639 = vmatpush3.bf16.msra.mxu1 %v2169_v53 }
 0x207   :  { %1640 = vmatprep.subr.bf16.mxu1 %v1925_v0  ;;  %1663 = vmatpush3.bf16.msra.mxu0 %v2169_v53 }
 0x208   :  { %1664 = vmatprep.subr.bf16.mxu0 %v1925_v0 }
 0x20a   :  { %1642 = vmatpush3.bf16.msra.mxu1 %v2180_v59 }
 0x20b   :  { %1643 = vmatprep.subr.bf16.mxu1 %v1925_v0  ;;  %1666 = vmatpush3.bf16.msra.mxu0 %v2180_v59 }
 0x20c   :  { %1667 = vmatprep.subr.bf16.mxu0 %v1925_v0 }
 0x20e   :  { %1645 = vmatpush3.bf16.msra.mxu1 %v2191_v3 }
 0x20f   :  { %1669 = vmatpush3.bf16.msra.mxu0 %v2191_v3  ;;  %1670 = vmatprep.subr.bf16.mxu1 %v1925_v0 }
 0x210   :  { %1718 = vmatprep.subr.bf16.mxu0 %v1925_v0 }
 0x2a4   :  { %v354_v4 = vpop.f32.mrb[0].mxu1  ;;  %v2236_v5 = vpop.f32.mrb[2].mxu0 }
 0x2a5   :  { %v356_v6 = vpop.f32.mrb[1].mxu1  ;;  %v2238_v7 = vpop.f32.mrb[3].mxu0  ;;  %v355_v9 = vadd.f32 %v354_v4, %v283_v8  ;;  %v426_v55 = vadd.f32 %v2236_v5, %v285_v54 }
 0x2a6   :  { %v357_v32 = vadd.f32 %v356_v6, %v284_v31 }
 0x2c4   :  { %v585_v10 = vpop.f32.mrb[4].mxu0 }
 0x2c5   :  { %v589_v11 = vadd.f32 %v585_v10, %v355_v9  ;;  %v1310_v12 = vpop.f32.mrb[5].mxu0 }
 0x2c7   :  { %v1065_v13 = vmul.f32 -1.442695, %v589_v11 }
 0x2c9   :  { %1760 = vpow2.f32 %v1065_v13 }
 0x2ca   :  { %1762 = vtanh.f32 %v589_v11 }
 0x2d3   :  { %v1761_v14 = vpop.eup %1760 }
 0x2d4   :  { %v594_v15 = vadd.f32 1.0, %v1761_v14  ;;  %v1763_v18 = vpop.eup %1762 }
 0x2d6   :  { %1764 = vrcp.f32 %v594_v15 }
 0x2e0   :  { %v1765_v19 = vpop.eup %1764 }
 0x2e1   :  { %v597_v20 = vsel %vm502_vm1, %v1763_v18, %v1765_v19 }
 0x2e2   :  { %602 = vrot.lane.b32.xlu1 %v597_v20, %s1929_s5  ;;  %598 = vrot.lane.b32.xlu0 %v597_v20, %s1930_s30 }
 0x2e6   :  { %600 = vrot.lane.b32.xlu1 %v597_v20, %s1928_s0 }
 0x354   :  { %v603_v21 = vpop.permute.xlu1 %602  ;;  %v599_v23 = vpop.permute.xlu0 %598 }
 0x355   :  { %v605_v24 = vmul.f32 %v603_v21, %v597_v20  ;;  %v604_v25 = vmul.f32 0.0, %v599_v23 }
 0x357   :  { %v606_v26 = vadd.f32 %v605_v24, %v604_v25  ;;  %v970_v25 = vld [vmem:[#allocation7] sm:$0xff] }
 0x358   :  { %v601_v28 = vpop.permute.xlu1 %600 }
 0x359   :  { %1766 = vtanh.f32 %v606_v26 }
 0x363   :  { %v1767_v27 = vpop.eup %1766 }
 0x364   :  { %v608_v30 = vmul.f32 %v1767_v27, %v601_v28  ;;  %v972_v27 = vld [vmem:[#allocation7 + $0x10] sm:$0xff] }
 0x366   :  { %1344 = vmatmul.mubr.f32.vlgmr.msra.gmra.mrb[4].mxu1 %v608_v30  ;;  %v973_v30 = vld [vmem:[#allocation7 + $0x18] sm:$0xff] }
 0x367   :  { %1672 = vmatpush3.bf16.msra.mxu1 %v2108_v22  ;;  %1413 = vmatprep.mubr.msk.f32.mxu1 %vm1926_vm0, %v1927_v1  ;;  %v1722_v31 = vpack.c.bf16 %v973_v30, %v972_v27 }
 0x368   :  { %1673 = vmatprep.subr.bf16.mxu1 %v1925_v0 }
 0x36b   :  { %1675 = vmatpush3.bf16.msra.mxu1 %v2121_v29 }
 0x36c   :  { %1676 = vmatprep.subr.bf16.mxu1 %v1925_v0 }
 0x36f   :  { %1678 = vmatpush3.bf16.msra.mxu1 %v2136_v35 }
 0x370   :  { %1679 = vmatprep.subr.bf16.mxu1 %v1925_v0 }
 0x373   :  { %1681 = vmatpush3.bf16.msra.mxu1 %v2147_v41 }
 0x374   :  { %1682 = vmatprep.subr.bf16.mxu1 %v1925_v0 }
 0x377   :  { %1684 = vmatpush3.bf16.msra.mxu1 %v2158_v47 }
 0x378   :  { %1685 = vmatprep.subr.bf16.mxu1 %v1925_v0 }
 0x37b   :  { %1687 = vmatpush3.bf16.msra.mxu1 %v2169_v53 }
 0x37c   :  { %1688 = vmatprep.subr.bf16.mxu1 %v1925_v0 }
 0x37f   :  { %1690 = vmatpush3.bf16.msra.mxu1 %v2180_v59 }
 0x380   :  { %1691 = vmatprep.subr.bf16.mxu1 %v1925_v0 }
 0x383   :  { %1693 = vmatpush3.bf16.msra.mxu1 %v2191_v3 }
 0x384   :  { %1694 = vmatprep.subr.bf16.mxu1 %v1925_v0 }
 0x439   :  { %v675_v33 = vpop.f32.mrb[4].mxu1 }
 0x43a   :  { %v679_v34 = vadd.f32 %v675_v33, %v357_v32  ;;  %v1345_v36 = vpop.f32.mrb[5].mxu1  ;;  %v974_v32 = vld [vmem:[#allocation7 + $0x20] sm:$0xff]  ;;  %v975_v33 = vld [vmem:[#allocation7 + $0x28] sm:$0xff] }
 0x43b   :  { %v287_v36 = vld [vmem:[#allocation6 + $0x20] sm:$0xff] }
 0x43c   :  { %v1066_v37 = vmul.f32 -1.442695, %v679_v34 }
 0x43e   :  { %1768 = vpow2.f32 %v1066_v37 }
 0x43f   :  { %1770 = vtanh.f32 %v679_v34  ;;  %v1725_v34 = vpack.c.bf16 %v975_v33, %v974_v32 }
 0x448   :  { %v1769_v38 = vpop.eup %1768 }
 0x449   :  { %v684_v39 = vadd.f32 1.0, %v1769_v38  ;;  %v1771_v40 = vpop.eup %1770 }
 0x44b   :  { %1772 = vrcp.f32 %v684_v39 }
 0x455   :  { %v1773_v42 = vpop.eup %1772 }
 0x456   :  { %v687_v43 = vsel %vm502_vm1, %v1771_v40, %v1773_v42  ;;  %v976_v42 = vld [vmem:[#allocation7 + $0x30] sm:$0xff] }
 0x457   :  { %692 = vrot.lane.b32.xlu1 %v687_v43, %s1929_s5  ;;  %688 = vrot.lane.b32.xlu0 %v687_v43, %s1930_s30 }
 0x45b   :  { %690 = vrot.lane.b32.xlu0 %v687_v43, %s1928_s0 }
 0x4c9   :  { %v693_v44 = vpop.permute.xlu1 %692  ;;  %v689_v45 = vpop.permute.xlu0 %688 }
 0x4ca   :  { %v695_v46 = vmul.f32 %v693_v44, %v687_v43  ;;  %v694_v48 = vmul.f32 %v689_v45, %v606_v26  ;;  %v971_v26 = vld [vmem:[#allocation7 + $0x8] sm:$0xff]  ;;  %v977_v43 = vld [vmem:[#allocation7 + $0x38] sm:$0xff] }
 0x4cb   :  { %v1719_v28 = vpack.c.bf16 %v971_v26, %v970_v25  ;;  %v1728_v45 = vpack.c.bf16 %v977_v43, %v976_v42 }
 0x4cc   :  { %v696_v49 = vadd.f32 %v695_v46, %v694_v48  ;;  %v978_v48 = vld [vmem:[#allocation7 + $0x40] sm:$0xff] }
 0x4cd   :  { %v691_v51 = vpop.permute.xlu0 %690 }
 0x4ce   :  { %1774 = vtanh.f32 %v696_v49 }
 0x4d8   :  { %v1775_v50 = vpop.eup %1774 }
 0x4d9   :  { %v698_v52 = vmul.f32 %v1775_v50, %v691_v51  ;;  %v980_v51 = vld [vmem:[#allocation7 + $0x50] sm:$0xff] }
 0x4db   :  { %1379 = vmatmul.mubr.f32.vlgmr.msra.gmra.mrb[6].mxu0 %v698_v52  ;;  %v981_v52 = vld [vmem:[#allocation7 + $0x58] sm:$0xff] }
 0x4dc   :  { %1483 = vmatprep.mubr.msk.f32.mxu0 %vm1926_vm0, %v1927_v1  ;;  %1720 = vmatpush3.bf16.msra.mxu0 %v1719_v28  ;;  %v1734_v54 = vpack.c.bf16 %v981_v52, %v980_v51 }
 0x4dd   :  { %1721 = vmatprep.subr.bf16.mxu0 %v1925_v0 }
 0x4e0   :  { %1723 = vmatpush3.bf16.msra.mxu0 %v1722_v31 }
 0x4e1   :  { %1724 = vmatprep.subr.bf16.mxu0 %v1925_v0 }
 0x4e4   :  { %1726 = vmatpush3.bf16.msra.mxu0 %v1725_v34 }
 0x4e5   :  { %1727 = vmatprep.subr.bf16.mxu0 %v1925_v0 }
 0x4e8   :  { %1729 = vmatpush3.bf16.msra.mxu0 %v1728_v45 }
 0x4e9   :  { %1730 = vmatprep.subr.bf16.mxu0 %v1925_v0 }
 0x5ae   :  { %v765_v56 = vpop.f32.mrb[6].mxu0 }
 0x5af   :  { %v769_v57 = vadd.f32 %v765_v56, %v426_v55  ;;  %v1380_v58 = vpop.f32.mrb[7].mxu0  ;;  %v982_v55 = vld [vmem:[#allocation7 + $0x60] sm:$0xff]  ;;  %v983_v56 = vld [vmem:[#allocation7 + $0x68] sm:$0xff] }
 0x5b0   :  { %v1737_v58 = vpack.c.bf16 %v983_v56, %v982_v55 }
 0x5b1   :  { %v1067_v60 = vmul.f32 -1.442695, %v769_v57 }
 0x5b3   :  { %1776 = vpow2.f32 %v1067_v60 }
 0x5b4   :  { %1778 = vtanh.f32 %v769_v57 }
 0x5bd   :  { %v1777_v61 = vpop.eup %1776 }
 0x5be   :  { %v774_v62 = vadd.f32 1.0, %v1777_v61  ;;  %v1779_v63 = vpop.eup %1778 }
 0x5c0   :  { %1780 = vrcp.f32 %v774_v62  ;;  %v984_v62 = vld [vmem:[#allocation7 + $0x70] sm:$0xff] }
 0x5ca   :  { %v1781_v2 = vpop.eup %1780 }
 0x5cb   :  { %v777_v4 = vsel %vm502_vm1, %v1779_v63, %v1781_v2  ;;  %v985_v63 = vld [vmem:[#allocation7 + $0x78] sm:$0xff] }
 0x5cc   :  { %782 = vrot.lane.b32.xlu0 %v777_v4, %s1929_s5  ;;  %778 = vrot.lane.b32.xlu1 %v777_v4, %s1930_s30  ;;  %v1740_v2 = vpack.c.bf16 %v985_v63, %v984_v62 }
 0x5d0   :  { %780 = vrot.lane.b32.xlu1 %v777_v4, %s1928_s0 }
 0x63e   :  { %v783_v5 = vpop.permute.xlu0 %782  ;;  %v779_v6 = vpop.permute.xlu1 %778 }
 0x63f   :  { %v785_v8 = vmul.f32 %v783_v5, %v777_v4  ;;  %v784_v9 = vmul.f32 %v779_v6, %v696_v49  ;;  %v979_v49 = vld [vmem:[#allocation7 + $0x48] sm:$0xff] }
 0x640   :  { %v1731_v50 = vpack.c.bf16 %v979_v49, %v978_v48 }
 0x641   :  { %v786_v10 = vadd.f32 %v785_v8, %v784_v9 }
 0x642   :  { %v781_v12 = vpop.permute.xlu1 %780  ;;  %1732 = vmatpush3.bf16.msra.mxu0 %v1731_v50 }
 0x643   :  { %1782 = vtanh.f32 %v786_v10  ;;  %1733 = vmatprep.subr.bf16.mxu0 %v1925_v0 }
 0x646   :  { %1735 = vmatpush3.bf16.msra.mxu0 %v1734_v54 }
 0x647   :  { %1736 = vmatprep.subr.bf16.mxu0 %v1925_v0 }
 0x64a   :  { %1738 = vmatpush3.bf16.msra.mxu0 %v1737_v58 }
 0x64b   :  { %1739 = vmatprep.subr.bf16.mxu0 %v1925_v0 }
 0x64d   :  { %v1783_v11 = vpop.eup %1782 }
 0x64e   :  { %v788_v13 = vmul.f32 %v1783_v11, %v781_v12  ;;  %1741 = vmatpush3.bf16.msra.mxu0 %v1740_v2 }
 0x650   :  { %1414 = vmatmul.mubr.f32.vlgmr.msra.gmra.mrb[6].mxu1 %v788_v13  ;;  %v986_v13 = vld [vmem:[#allocation9] sm:$0xff] }
 0x651   :  { %1696 = vmatpush3.bf16.msra.mxu1 %v2108_v22  ;;  %1448 = vmatprep.mubr.msk.f32.mxu1 %vm1926_vm0, %v1927_v1  ;;  %v286_v1 = vld [vmem:[#allocation6 + $0x18] sm:$0xff] }
 0x652   :  { %1697 = vmatprep.subr.bf16.mxu1 %v1925_v0  ;;  %v428_v22 = vadd.f32 %v2238_v7, %v286_v1 }
 0x655   :  { %1699 = vmatpush3.bf16.msra.mxu1 %v2121_v29 }
 0x656   :  { %1700 = vmatprep.subr.bf16.mxu1 %v1925_v0 }
 0x659   :  { %1702 = vmatpush3.bf16.msra.mxu1 %v2136_v35 }
 0x65a   :  { %1703 = vmatprep.subr.bf16.mxu1 %v1925_v0 }
 0x65d   :  { %1705 = vmatpush3.bf16.msra.mxu1 %v2147_v41 }
 0x65e   :  { %1706 = vmatprep.subr.bf16.mxu1 %v1925_v0 }
 0x661   :  { %1708 = vmatpush3.bf16.msra.mxu1 %v2158_v47 }
 0x662   :  { %1709 = vmatprep.subr.bf16.mxu1 %v1925_v0 }
 0x665   :  { %1711 = vmatpush3.bf16.msra.mxu1 %v2169_v53 }
 0x666   :  { %1712 = vmatprep.subr.bf16.mxu1 %v1925_v0 }
 0x669   :  { %1714 = vmatpush3.bf16.msra.mxu1 %v2180_v59 }
 0x66a   :  { %1715 = vmatprep.subr.bf16.mxu1 %v1925_v0 }
 0x66d   :  { %1717 = vmatpush3.bf16.msra.mxu1 %v2191_v3 }
 0x723   :  { %v855_v29 = vpop.f32.mrb[6].mxu1 }
 0x724   :  { %v859_v35 = vadd.f32 %v855_v29, %v428_v22  ;;  %v1415_v41 = vpop.f32.mrb[7].mxu1 }
 0x726   :  { %v1068_v14 = vmul.f32 -1.442695, %v859_v35 }
 0x728   :  { %1784 = vpow2.f32 %v1068_v14 }
 0x729   :  { %1786 = vtanh.f32 %v859_v35 }
 0x732   :  { %v1785_v47 = vpop.eup %1784 }
 0x733   :  { %v864_v15 = vadd.f32 1.0, %v1785_v47  ;;  %v1787_v53 = vpop.eup %1786 }
 0x735   :  { %1788 = vrcp.f32 %v864_v15 }
 0x73f   :  { %v1789_v16 = vpop.eup %1788 }
 0x740   :  { %v867_v59 = vsel %vm502_vm1, %v1787_v53, %v1789_v16 }
 0x741   :  { %872 = vrot.lane.b32.xlu1 %v867_v59, %s1929_s5  ;;  %868 = vrot.lane.b32.xlu0 %v867_v59, %s1930_s30 }
 0x745   :  { %870 = vrot.lane.b32.xlu0 %v867_v59, %s1928_s0 }
 0x7b3   :  { %v873_v3 = vpop.permute.xlu1 %872  ;;  %v869_v7 = vpop.permute.xlu0 %868 }
 0x7b4   :  { %v875_v18 = vmul.f32 %v873_v3, %v867_v59  ;;  %v874_v19 = vmul.f32 %v869_v7, %v786_v10 }
 0x7b6   :  { %v2302_v20 = vadd.f32 %v875_v18, %v874_v19 }
 0x7b7   :  { %v871_v23 = vpop.permute.xlu0 %870 }
 0x7b8   :  { %1790 = vtanh.f32 %v2302_v20 }
 0x7c2   :  { %v1791_v21 = vpop.eup %1790 }
 0x7c3   :  { %v878_v24 = vmul.f32 %v1791_v21, %v871_v23 }
 0x7c5   :  { %1449 = vmatmul.mubr.f32.vlgmr.msra.gmra.mrb[2].mxu1 %v878_v24 }
 0x898   :  { %v945_v37 = vpop.f32.mrb[2].mxu1 }
 0x899   :  { %v1742_v38 = vadd.f32 %v945_v37, %v287_v36  ;;  %v1450_v39 = vpop.f32.mrb[3].mxu1 }
 0x89b   :  { %v1069_v40 = vmul.f32 -1.442695, %v1742_v38 }
 0x89d   :  { %1792 = vpow2.f32 %v1069_v40 }
 0x89e   :  { %1794 = vtanh.f32 %v1742_v38 }
 0x8a7   :  { %v1793_v44 = vpop.eup %1792 }
 0x8a8   :  { %v954_v46 = vadd.f32 1.0, %v1793_v44  ;;  %v1795_v57 = vpop.eup %1794 }
 0x8aa   :  { %1796 = vrcp.f32 %v954_v46 }
 0x8b4   :  { %v1797_v60 = vpop.eup %1796 }
 0x8b5   :  { %v957_v61 = vsel %vm502_vm1, %v1795_v57, %v1797_v60 }
 0x8b6   :  { %962 = vrot.lane.b32.xlu0 %v957_v61, %s1929_s5  ;;  %958 = vrot.lane.b32.xlu1 %v957_v61, %s1930_s30 }
 0x8ba   :  { %960 = vrot.lane.b32.xlu1 %v957_v61, %s1928_s0 }
 0x928   :  { %v963_v4 = vpop.permute.xlu0 %962  ;;  %v959_v5 = vpop.permute.xlu1 %958 }
 0x929   :  { %v965_v6 = vmul.f32 %v963_v4, %v957_v61  ;;  %v964_v8 = vmul.f32 %v959_v5, %v2302_v20 }
 0x92b   :  { %v966_v17 = vadd.f32 %v965_v6, %v964_v8 }
 0x92c   :  { %v961_v10 = vpop.permute.xlu1 %960 }
 0x92d   :  { %1798 = vtanh.f32 %v966_v17 }
 0x937   :  { %v1799_v9 = vpop.eup %1798 }
 0x938   :  { %v968_v11 = vmul.f32 %v1799_v9, %v961_v10 }
 0x93a   :  { %v969_v12 = vmax.f32 %v968_v11, 0.0 }
 0x93c   :  { %1484 = vmatmul.mubr.f32.vlgmr.msra.gmra.mrb[8].mxu0 %v969_v12 }
 0xa0f   :  { %v1053_v1 = vpop.f32.mrb[8].mxu0 }
 0xa10   :  { %v1054_v22 = vadd.f32 %v1053_v1, %v986_v13  ;;  %v1485_v0 = vpop.f32.mrb[9].mxu0 }
 0xa12   :  { %1057 = vst [vmem:[%s2329_s8] sm:$0xff] %v1054_v22 }
 0xa13   :  { %1062 = vsyncpa [#allocation3], 1 }
 0xa14   :  { %1063 = vsyncpa [#allocation5], 1 }
 0xa15   :  { %1064 = vsyncpa [#allocation8], 1 }

</bundles_post_ra>
